<compile_context>
chip_gen: v7x
topology: tpu7x:2x2x1
jax: 0.10.0
libtpu: 0.0.40
codegen_flags: <defaults>
</compile_context>

<pallas_src>
import functools

import jax
import jax.numpy as jnp
from jax.experimental import pallas as pl
from jax.experimental.pallas import tpu as pltpu


ALPHA = 0.25
GAMMA = 2.0   # static; (1-pt)**GAMMA is lowered to an explicit square in-kernel


def _round_up(x, m):
    return ((x + m - 1) // m) * m


def _round_down(x, m):
    return (x // m) * m


def _scoped_vmem_limit_bytes():
    """Per-generation scoped-VMEM limit: ~5/8 of physical, capped at 96 MiB."""
    physical = 64 << 20  # conservative fallback (v7x per-TC physical VMEM)
    try:
        info = pltpu.get_tpu_info()
        cap = getattr(info, "vmem_capacity_bytes", None)
        if cap:
            physical = int(cap)
    except Exception:
        pass
    return int(min(physical * 5 // 8, 96 << 20))


def _focal_loss_kernel(logits_ref, targets_ref, out_ref, *,
                       n_total, tile_n, tiles_per_split):
    s = pl.program_id(0)   # TensorCore split ("parallel")
    j = pl.program_id(1)   # row-tile reduction ("arbitrary")

    @pl.when(j == 0)
    def _():
        out_ref[...] = jnp.zeros_like(out_ref)

    x = logits_ref[...].astype(jnp.float32)          # (tile_n, C)
    t = targets_ref[...]                             # (tile_n, 1) int32
    tn, c = x.shape

    # Gather the target logit from raw x (so `x - m` below has a single
    # consumer, the exp-sum, and fuses into that reduction loop).
    class_ids = jax.lax.broadcasted_iota(jnp.int32, (tn, c), 1)
    tgt = jnp.sum(jnp.where(class_ids == t, x, 0.0), axis=1, keepdims=True)

    # Numerically-stable log-sum-exp along the class (lane) axis.
    m = jnp.max(x, axis=1, keepdims=True)            # (tile_n, 1)
    lse = jnp.log(jnp.sum(jnp.exp(x - m), axis=1, keepdims=True))

    nll = lse - (tgt - m)                            # = -log p_t   (tile_n, 1)
    pt = jnp.exp(-nll)
    one_m_pt = 1.0 - pt
    row_loss = (ALPHA * one_m_pt * one_m_pt) * nll   # alpha_t == ALPHA; gamma=2 => square

    # Mask rows beyond N (padded last tile + clamped duplicate tiles of the
    # core split). Keep this a select, not a multiply, so garbage rows that
    # produced inf/NaN are discarded rather than propagated.
    tile_idx = s * tiles_per_split + j
    row_ids = tile_idx * tile_n + jax.lax.broadcasted_iota(jnp.int32, (tn, 1), 0)
    row_loss = jnp.where(row_ids < n_total, row_loss, 0.0)

    out_ref[...] += jnp.sum(row_loss)


def focal_loss_mean(logits, targets, *, max_tile_rows=8192):
    """logits: (N, C) f32/bf16, targets: (N,) int. Returns scalar mean focal loss."""
    n, c = logits.shape
    itemsize = jnp.dtype(logits.dtype).itemsize
    sublane = 16 if itemsize == 2 else 8

    vmem_limit = _scoped_vmem_limit_bytes()

    # Bytes-based row tile: aim for ~4 MiB logits DMA blocks, stay inside the
    # scoped VMEM limit counting double-buffered logits, f32 upcast + one f32
    # elementwise temp, and the 128-lane padded (tile_n, 1) targets buffers.
    target_block_bytes = 4 << 20
    rows_by_target = _round_down(target_block_bytes // max(1, c * itemsize), sublane)

    per_row_bytes = (2 * c * itemsize          # logits, double-buffered
                     + 2 * c * 4               # f32 upcast + elementwise temp
                     + 2 * 128 * 4)            # targets, lane-padded, double-buffered
    usable = max(1 << 20, vmem_limit - (4 << 20))   # headroom for internal scratch
    rows_by_vmem = _round_down(usable // per_row_bytes, sublane)

    max_tile_rows = max(sublane, _round_down(max_tile_rows, sublane))
    tile_n = min(max(sublane, rows_by_target),
                 max(sublane, rows_by_vmem),
                 max_tile_rows,
                 _round_up(n, sublane))
    tile_n = max(tile_n, sublane)

    n_tiles = pl.cdiv(n, tile_n)
    # Leading "parallel" axis: sharded across the 2 TensorCores on v7x,
    # serialized (neutral) on single-TC chips.
    num_splits = 2 if n_tiles >= 2 else 1
    tiles_per_split = pl.cdiv(n_tiles, num_splits)
    grid = (num_splits, tiles_per_split)

    def _tile_map(s, j):
        # Clamp out-of-range tile indices of the split to the last real tile;
        # their contribution is zeroed by the in-kernel row mask.
        return (jnp.minimum(s * tiles_per_split + j, n_tiles - 1), 0)

    targets_col = targets.astype(jnp.int32).reshape(n, 1)

    kernel = functools.partial(
        _focal_loss_kernel,
        n_total=n, tile_n=tile_n, tiles_per_split=tiles_per_split,
    )

    partials = pl.pallas_call(
        kernel,
        out_shape=jax.ShapeDtypeStruct((num_splits, 1), jnp.float32),
        grid=grid,
        in_specs=[
            pl.BlockSpec((tile_n, c), _tile_map),
            pl.BlockSpec((tile_n, 1), _tile_map),
        ],
        out_specs=pl.BlockSpec((1, 1), lambda s, j: (s, 0)),
        compiler_params=pltpu.CompilerParams(
            dimension_semantics=("parallel", "arbitrary"),
            vmem_limit_bytes=vmem_limit,
        ),
        cost_estimate=pl.CostEstimate(
            flops=8 * n * c,
            transcendentals=n * c + 2 * n,
            bytes_accessed=n * c * itemsize + n * 4 + num_splits * 4,
        ),
    )(logits, targets_col)

    # reduction='mean' => mean over all N*C elements (matches torch .mean() of
    # this particular implementation's (N, C) loss tensor).
    return jnp.sum(partials) * (1.0 / (n * c))


def _focal_loss_ref(logits, targets):
    # Pure-JAX reference matching the PyTorch forward (multi-class, 'mean').
    n, c = logits.shape
    x = logits.astype(jnp.float32)
    one_hot = jax.nn.one_hot(targets, c, dtype=jnp.float32)
    log_softmax = jax.nn.log_softmax(x, axis=1)
    ce_loss = -one_hot * log_softmax
    probs = jnp.exp(log_softmax)
    pt = jnp.sum(one_hot * probs, axis=1)
    alpha = ALPHA * one_hot + (1.0 - ALPHA) * (1.0 - one_hot)
    alpha_t = jnp.sum(alpha * one_hot, axis=1)
    focal_weight = alpha_t * (1.0 - pt) ** GAMMA
    loss = focal_weight[:, None] * ce_loss
    return jnp.mean(loss)


if __name__ == "__main__":
    key = jax.random.PRNGKey(0)
    k1, k2, k3, k4 = jax.random.split(key, 4)

    # Case 1: batch of 8 samples, 32 classes (single tile, num_splits=1).
    N, C = 8, 32
    logits = jax.random.normal(k1, (N, C), dtype=jnp.float32)
    targets = jax.random.randint(k2, (N,), 0, C, dtype=jnp.int32)
    loss = jax.block_until_ready(focal_loss_mean(logits, targets))
    ref = _focal_loss_ref(logits, targets)
    assert jnp.allclose(loss, ref, atol=1e-5, rtol=1e-5), (loss, ref)

    # Case 2: N not a multiple of the row tile -> exercises the multi-step
    # accumulator, the padded-row mask, the 2-way core split, and the clamped
    # out-of-range tile of the split (max_tile_rows forced small).
    N2, C2 = 20, 32
    logits2 = jax.random.normal(k3, (N2, C2), dtype=jnp.float32)
    targets2 = jax.random.randint(k4, (N2,), 0, C2, dtype=jnp.int32)
    loss2 = jax.block_until_ready(focal_loss_mean(logits2, targets2, max_tile_rows=8))
    ref2 = _focal_loss_ref(logits2, targets2)
    assert jnp.allclose(loss2, ref2, atol=1e-5, rtol=1e-5), (loss2, ref2)

    # TODO(synk): binary (C==1 BCE-with-logits) branch and 'sum'/'none'
    # reductions not kernelized; only the default multi-class 'mean' path is.
    # TODO(synk): bf16 elementwise math (keep max/sub/select in bf16 on
    # v6e/v7x) and a flash-style online-LSE fallback for very large C are
    # intentionally not implemented (accuracy / portability first).
    print("KERNEL_OK")
</pallas_src>

<mosaic_0001>
module attributes {stable_mosaic.version = 11 : i64} {
  func.func @_focal_loss_kernel(%arg0: i32, %arg1: i32, %arg2: memref<8x32xf32, #tpu.memory_space<vmem>>, %arg3: memref<8x1xi32, #tpu.memory_space<vmem>>, %arg4: memref<1x1xf32, #tpu.memory_space<vmem>>) attributes {dimension_semantics = [#tpu.dimension_semantics<parallel>, #tpu.dimension_semantics<arbitrary>], iteration_bounds = array<i64: 1, 1>, scalar_prefetch = 0 : i64, scratch_operands = 0 : i64, tpu.core_type = #tpu.core_type<tc>, window_params = [{transform_indices = @transform_0, window_bounds = array<i64: 8, 32>}, {transform_indices = @transform_1, window_bounds = array<i64: 8, 1>}, {transform_indices = @transform_2, window_bounds = array<i64: 1, 1>}]} {
    %c0_i32 = arith.constant 0 : i32
    %0 = arith.cmpi eq, %arg1, %c0_i32 : i32
    %1 = arith.extui %0 : i1 to i32
    %c0_i32_0 = arith.constant 0 : i32
    %2 = arith.cmpi ne, %1, %c0_i32_0 : i32
    scf.if %2 {
      %cst_17 = arith.constant 0.000000e+00 : f32
      %49 = vector.broadcast %cst_17 : f32 to vector<1x1xf32>
      %c0_18 = arith.constant 0 : index
      %c0_19 = arith.constant 0 : index
      %50 = vector.load %arg4[%c0_18, %c0_19] : memref<1x1xf32, #tpu.memory_space<vmem>>, vector<1x1xf32>
      tpu.vector_store %arg4[%c0_18, %c0_19], %49 {strides = array<i32>} : memref<1x1xf32, #tpu.memory_space<vmem>>, vector<1x1xf32>,
    } else {
    }
    %c0 = arith.constant 0 : index
    %c0_1 = arith.constant 0 : index
    %3 = vector.load %arg2[%c0, %c0_1] : memref<8x32xf32, #tpu.memory_space<vmem>>, vector<8x32xf32>
    %c0_2 = arith.constant 0 : index
    %c0_3 = arith.constant 0 : index
    %4 = vector.load %arg3[%c0_2, %c0_3] : memref<8x1xi32, #tpu.memory_space<vmem>>, vector<8x1xi32>
    %5 = tpu.iota {dimensions = array<i32: 1>} : vector<8x32xi32>
    %6 = vector.broadcast %4 : vector<8x1xi32> to vector<8x32xi32>
    %7 = arith.cmpi eq, %5, %6 : vector<8x32xi32>
    %cst = arith.constant 0.000000e+00 : f32
    %8 = vector.broadcast %cst : f32 to vector<8x32xf32>
    %9 = arith.select %7, %3, %8 : vector<8x32xi1>, vector<8x32xf32>
    %cst_4 = arith.constant dense<0.000000e+00> : vector<8xf32>
    %10 = vector.multi_reduction <add>, %9, %cst_4 [1] : vector<8x32xf32> to vector<8xf32>
    %11 = vector.shape_cast %10 : vector<8xf32> to vector<8x1xf32>
    %cst_5 = arith.constant dense<0xFF800000> : vector<8xf32>
    %12 = vector.multi_reduction <maximumf>, %3, %cst_5 [1] : vector<8x32xf32> to vector<8xf32>
    %13 = vector.shape_cast %12 : vector<8xf32> to vector<8x1xf32>
    %14 = vector.broadcast %13 : vector<8x1xf32> to vector<8x32xf32>
    %15 = arith.subf %3, %14 : vector<8x32xf32>
    %16 = math.exp %15 : vector<8x32xf32>
    %cst_6 = arith.constant dense<0.000000e+00> : vector<8xf32>
    %17 = vector.multi_reduction <add>, %16, %cst_6 [1] : vector<8x32xf32> to vector<8xf32>
    %18 = vector.shape_cast %17 : vector<8xf32> to vector<8x1xf32>
    %19 = math.log %18 : vector<8x1xf32>
    %20 = arith.subf %11, %13 : vector<8x1xf32>
    %21 = arith.subf %19, %20 : vector<8x1xf32>
    %cst_7 = arith.constant 0.000000e+00 : f32
    %22 = vector.broadcast %cst_7 : f32 to vector<8x1xf32>
    %23 = arith.subf %22, %21 : vector<8x1xf32>
    %24 = math.exp %23 : vector<8x1xf32>
    %cst_8 = arith.constant 1.000000e+00 : f32
    %25 = vector.broadcast %cst_8 : f32 to vector<8x1xf32>
    %26 = arith.subf %25, %24 : vector<8x1xf32>
    %cst_9 = arith.constant 2.500000e-01 : f32
    %27 = vector.broadcast %cst_9 : f32 to vector<8x1xf32>
    %28 = arith.mulf %27, %26 : vector<8x1xf32>
    %29 = arith.mulf %28, %26 : vector<8x1xf32>
    %30 = arith.mulf %29, %21 : vector<8x1xf32>
    %c1_i32 = arith.constant 1 : i32
    %31 = arith.muli %arg0, %c1_i32 : i32
    %32 = arith.addi %31, %arg1 : i32
    %c8_i32 = arith.constant 8 : i32
    %33 = arith.muli %32, %c8_i32 : i32
    %34 = tpu.iota {dimensions = array<i32: 0>} : vector<8x1xi32>
    %35 = vector.broadcast %33 : i32 to vector<8x1xi32>
    %36 = arith.addi %35, %34 : vector<8x1xi32>
    %c8_i32_10 = arith.constant 8 : i32
    %37 = vector.broadcast %c8_i32_10 : i32 to vector<8x1xi32>
    %38 = arith.cmpi slt, %36, %37 : vector<8x1xi32>
    %cst_11 = arith.constant 0.000000e+00 : f32
    %39 = vector.broadcast %cst_11 : f32 to vector<8x1xf32>
    %40 = arith.select %38, %30, %39 : vector<8x1xi1>, vector<8x1xf32>
    %c0_12 = arith.constant 0 : index
    %c0_13 = arith.constant 0 : index
    %41 = vector.load %arg4[%c0_12, %c0_13] : memref<1x1xf32, #tpu.memory_space<vmem>>, vector<1x1xf32>
    %42 = vector.shape_cast %40 : vector<8x1xf32> to vector<1x8x1xf32>
    %cst_14 = arith.constant dense<0.000000e+00> : vector<1xf32>
    %43 = vector.multi_reduction <add>, %42, %cst_14 [1, 2] : vector<1x8x1xf32> to vector<1xf32>
    %44 = vector.shape_cast %43 : vector<1xf32> to vector<1x1x1xf32>
    %45 = vector.extract %44[0, 0, 0] : f32 from vector<1x1x1xf32>
    %46 = vector.broadcast %45 : f32 to vector<1x1xf32>
    %47 = arith.addf %41, %46 : vector<1x1xf32>
    %c0_15 = arith.constant 0 : index
    %c0_16 = arith.constant 0 : index
    %48 = vector.load %arg4[%c0_15, %c0_16] : memref<1x1xf32, #tpu.memory_space<vmem>>, vector<1x1xf32>
    tpu.vector_store %arg4[%c0_15, %c0_16], %47 {strides = array<i32>} : memref<1x1xf32, #tpu.memory_space<vmem>>, vector<1x1xf32>,
    return
  }
  func.func @transform_0(%arg0: i32, %arg1: i32) -> (i32, i32) {
    %c1_i32 = arith.constant 1 : i32
    %0 = arith.muli %arg0, %c1_i32 : i32
    %1 = arith.addi %0, %arg1 : i32
    %c0_i32 = arith.constant 0 : i32
    %2 = arith.minsi %1, %c0_i32 : i32
    %c0_i32_0 = arith.constant 0 : i32
    %c0_i32_1 = arith.constant 0 : i32
    return %2, %c0_i32_0 : i32, i32
  }
  func.func @transform_1(%arg0: i32, %arg1: i32) -> (i32, i32) {
    %c1_i32 = arith.constant 1 : i32
    %0 = arith.muli %arg0, %c1_i32 : i32
    %1 = arith.addi %0, %arg1 : i32
    %c0_i32 = arith.constant 0 : i32
    %2 = arith.minsi %1, %c0_i32 : i32
    %c0_i32_0 = arith.constant 0 : i32
    %c0_i32_1 = arith.constant 0 : i32
    return %2, %c0_i32_0 : i32, i32
  }
  func.func @transform_2(%arg0: i32, %arg1: i32) -> (i32, i32) {
    %c0_i32 = arith.constant 0 : i32
    %c0_i32_0 = arith.constant 0 : i32
    return %arg0, %c0_i32 : i32, i32
  }
}

</mosaic_0001>

<bundles_post_ra>
// kernel: tpu_custom_call.1
= control target key start
LH: loop header
LB: loop body
LE: loop exit
PB: predicated region body
PF: predicated region fallthrough
CT: control target
= control target key end

     0   :  { %vm81_vm0 = vcmask 261120   ;;  %s232_s0 = inlined_call_operand.vmem [shape: f32[8,32], index: 0, kind: input, shape index: {}]   ;;  %s233_s1 = inlined_call_operand.vmem [shape: s32[8,1], index: 1, kind: input, shape index: {}]   ;;  %s234_s2 = inlined_call_operand.hbm [shape: f32[1,1], index: 2, kind: output, shape index: {}]  }
   0x1   :  { %v72_v0 = vld [vmem:[%s232_s0] sm:$0xff] }
   0x2   :  { %7 = vsyncpa [#allocation3], 0  ;;  %v85_v1 = vsel %vm81_vm0, %v72_v0, -inf  ;;  %v191_v2 = vmov 0   ;;  %v73_v3 = vld [vmem:[%s233_s1] sm:$0xff]  ;;  %v74_v7 = vlaneseq  ;;  %vm114_vm2 = vcmask 7168  }
   0x3   :  { %160 = vset.pattern.permute.xlu0 %v191_v2  ;;  %vm70_vm3 = vcmask 0   ;;  %v192_v28 = vmov 0.0   ;;  %s193_s0 = smov [#allocation2]  }
   0x4   :  { %86 = vmax.xlane.f32.xlu0 %v85_v1  ;;  %v75_v8 = vand.u32 127, %v74_v7  ;;  %71 = vst.msk [vmem:[#allocation2] sm:$0x1] %vm70_vm3, %v192_v28  ;;  %s135_s1 = sshll.u32 %s193_s0, 4  ;;  %s136_s1 = int_to_ptr.vmem [resolvable:$true] %s135_s1 }
   0x5   :  { %s167_s14 = scalar_lea.vmem %s136_s1, 16  ;;  %s171_s15 = scalar_lea.vmem %s136_s1, 32 }
   0x6   :  { %p168_p0 = scmp.ne.s32.totalorder %s136_s1, %s167_s14  ;;  %p172_p1 = scmp.lt.s32.totalorder %s136_s1, %s136_s1 }
   0x7   :  { %p173_p2 = scmp.lt.s32.totalorder %s171_s15, %s167_s14 }
   0x9   :  { %p174_p3 = por %p173_p2, %p172_p1 }
   0xb   :  { %v113_v36 = vld [vmem:[#allocation2] sm:$0x1]  ;;  %p175_p4 = pnand %p174_p3, %p168_p0 }
  0x1a   :  { %77 = vperm.xlu0 %160, %v73_v3  }
  0x91   :  { %v87_v4 = vpop.xlane.xlu0 %86 }
  0x92   :  { %v88_v5 = vsub.f32 %v72_v0, %v87_v4 }
  0x94   :  { %v89_v6 = vmul.f32 1.442695, %v88_v5 }
  0x96   :  { %161 = vpow2.f32 %v89_v6 }
  0x99   :  { %v78_v9 = vpop.permute.xlu0 %77 }
  0x9a   :  { %vm79_vm1 = vcmp.eq.s32.totalorder %v75_v8, %v78_v9 }
  0x9b   :  { %v80_v11 = vsel %vm79_vm1, %v72_v0, 0.0 }
  0x9c   :  { %v82_v13 = vsel %vm81_vm0, %v80_v11, 0.0 }
  0xa0   :  { %v162_v10 = vpop.eup %161 }
  0xa1   :  { %v91_v12 = vsel %vm81_vm0, %v162_v10, 0.0 }
  0xa2   :  { %92 = vadd.xlane.f32.xlu1 %v91_v12 }
  0xa6   :  { %83 = vadd.xlane.f32.xlu1 %v82_v13 }
 0x12f   :  { %v93_v14 = vpop.xlane.xlu1 %92 }
 0x130   :  { %163 = vlog2.f32 %v93_v14 }
 0x133   :  { %v84_v15 = vpop.xlane.xlu1 %83 }
 0x134   :  { %v96_v18 = vsub.f32 %v84_v15, %v87_v4 }
 0x13a   :  { %v164_v16 = vpop.eup %163 }
 0x13b   :  { %v95_v17 = vmul.f32 0.6931472, %v164_v16 }
 0x13d   :  { %v97_v19 = vsub.f32 %v95_v17, %v96_v18 }
 0x13f   :  { %v98_v20 = vsub.f32 0.0, %v97_v19 }
 0x141   :  { %v99_v21 = vmul.f32 1.442695, %v98_v20 }
 0x143   :  { %165 = vpow2.f32 %v99_v21 }
 0x14d   :  { %v166_v22 = vpop.eup %165 }
 0x14e   :  { %v101_v23 = vsub.f32 1.0, %v166_v22 }
 0x150   :  { %v102_v24 = vmul.f32 0.25, %v101_v23 }
 0x152   :  { %v103_v25 = vmul.f32 %v102_v24, %v101_v23 }
 0x154   :  { %v104_v26 = vmul.f32 %v103_v25, %v97_v19 }
 0x156   :  { %v115_v27 = vsel %vm114_vm2, %v104_v26, 0.0 }
 0x157   :  { %116 = vadd.xlane.f32.xlu1 %v115_v27 }
 0x1e4   :  { %v117_v29 = vpop.xlane.xlu1 %116 }
 0x1e5   :  { %v118_v30 = vrot.slane %v117_v29, 4 }
 0x1e7   :  { %v119_v31 = vadd.f32 %v118_v30, %v117_v29 }
 0x1e9   :  { %v120_v32 = vrot.slane %v119_v31, 2 }
 0x1eb   :  { %v121_v33 = vadd.f32 %v120_v32, %v119_v31 }
 0x1ed   :  { %v122_v34 = vrot.slane %v121_v33, 1 }
 0x1ef   :  { %v123_v35 = vadd.f32 %v122_v34, %v121_v33 }
 0x1f1   :  { %155 = vpush %v123_v35 }
 0x222   :  { %s156_s13 = spop %155 }
 0x223   :  { %v125_v37 = vstv %s156_s13 }
 0x224   :  { %v126_v38 = vadd.f32 %v125_v37, %v113_v36 }
 0x226   :  { %128 = vst.msk [vmem:[#allocation2] sm:$0x1] %vm70_vm3, %v126_v38 }
 0x227   :  { %178 = shalt.err (!%p175_p4)
}
 0x228   :  { %s179_s18 = scalar_lea.hbm %s234_s2, 16 }
 0x229   :  { %p180_p5 = scmp.ne.s32.totalorder %s234_s2, %s179_s18  ;;  %p183_p6 = scmp.lt.u32.totalorder %s179_s18, %s234_s2 }
 0x22b   :  { %p185_p7 = pnand %p183_p6, %p180_p5 }
 0x22d   :  { %188 = shalt.err (!%p185_p7)
}
 0x22e   :  { %138 = dma.vmem_to_hbm [thread:$0]  %s136_s1, 16, %s234_s2, [#allocation3]  }
 0x22f   :  { %189 = dma.done.wait [#allocation3], 16  }
 0x230   :  { %190 = vsyncadd [#allocation3], 4294967280 }
 0x231   :  { %142 = vsyncpa [#allocation3], 1 }

</bundles_post_ra>
